<compile_context>
chip_gen: v6e
topology: v6e:2x2x1
jax: 0.10.0
libtpu: 0.0.40
codegen_flags: <defaults>
</compile_context>

<pallas_src>
import functools
import math

import jax
import jax.numpy as jnp
from jax.experimental import pallas as pl
from jax.experimental.pallas import tpu as pltpu

SIGMA = 10.0  # matches the module-level `sigma = 10` in the PyTorch source


def _gaussian_kernel_body(x1_ref, x2_ref, o_ref, *, coeff):
    # x1/x2 block: [TM, D]; o block: [TM, 1]
    d = x1_ref[...].astype(jnp.float32) - x2_ref[...].astype(jnp.float32)
    ss = jnp.sum(d * d, axis=-1, keepdims=True)          # ||x1 - x2||^2 per row
    o_ref[...] = jnp.exp(ss * coeff).astype(o_ref.dtype)  # exp on the EUP


def _gaussian_kernel_2d(x1, x2, *, sigma=SIGMA, block_rows=512):
    """x1, x2: [N, D] -> [N]."""
    N, D = x1.shape

    # Row tile: biggest of (block_rows, N), rounded to the sublane multiple (8).
    tm = min(block_rows, max(N, 8))
    tm = max(8, (tm // 8) * 8)

    n_pad = pl.cdiv(N, tm) * tm
    if n_pad != N:
        pad = n_pad - N
        x1 = jnp.pad(x1, ((0, pad), (0, 0)))
        x2 = jnp.pad(x2, ((0, pad), (0, 0)))

    coeff = -1.0 / (2.0 * sigma * sigma)

    out = pl.pallas_call(
        functools.partial(_gaussian_kernel_body, coeff=coeff),
        out_shape=jax.ShapeDtypeStruct((n_pad, 1), jnp.float32),
        grid=(n_pad // tm,),
        in_specs=[
            pl.BlockSpec((tm, D), lambda i: (i, 0)),
            pl.BlockSpec((tm, D), lambda i: (i, 0)),
        ],
        out_specs=pl.BlockSpec((tm, 1), lambda i: (i, 0)),
        compiler_params=pltpu.CompilerParams(
            dimension_semantics=("parallel",),
        ),
    )(x1, x2)

    return out[:N, 0]


def gaussian_kernel(x1, x2, *, sigma=SIGMA, block_rows=512):
    """Pallas equivalent of gaussianKernel.forward: reduce over dim=1.

    Supports the common 2-D case [N, D] -> [N]; higher-rank inputs are handled
    by moving dim 1 to the lane axis and flattening the remaining dims (glue
    reshape/transpose outside the kernel).
    """
    assert x1.shape == x2.shape, "x1 and x2 must have the same shape"
    if x1.ndim == 2:
        return _gaussian_kernel_2d(x1, x2, sigma=sigma, block_rows=block_rows)

    # Higher-rank: torch.norm(..., dim=1) keeps all other dims.
    perm = (0,) + tuple(range(2, x1.ndim)) + (1,)
    x1m = jnp.transpose(x1, perm)
    x2m = jnp.transpose(x2, perm)
    lead_shape = x1m.shape[:-1]
    d = x1m.shape[-1]
    flat = _gaussian_kernel_2d(
        x1m.reshape(-1, d), x2m.reshape(-1, d), sigma=sigma, block_rows=block_rows
    )
    return flat.reshape(lead_shape)


if __name__ == "__main__":
    # Small but non-trivial shapes: 2048 rows of 128-dim features
    # (1 MiB per input in f32), grid of 4 row-tiles of 512 rows.
    N, D = 2048, 128

    key = jax.random.PRNGKey(0)
    k1, k2 = jax.random.split(key)
    x1 = jax.random.normal(k1, (N, D), jnp.float32)
    x2 = jax.random.normal(k2, (N, D), jnp.float32)

    fwd = jax.jit(gaussian_kernel)
    out = jax.block_until_ready(fwd(x1, x2))

    # Pure-JAX reference (same math as the PyTorch module).
    ref = jnp.exp(-jnp.sum((x1 - x2) ** 2, axis=1) / (2.0 * SIGMA**2))

    assert out.shape == (N,)
    assert bool(jnp.all(jnp.isfinite(out)))
    assert bool(jnp.allclose(out, ref, atol=1e-6, rtol=1e-6))
    print("KERNEL_OK")
</pallas_src>

<mosaic_0001>
module attributes {stable_mosaic.version = 11 : i64} {
  func.func @_gaussian_kernel_body(%arg0: i32, %arg1: memref<512x128xf32, #tpu.memory_space<vmem>>, %arg2: memref<512x128xf32, #tpu.memory_space<vmem>>, %arg3: memref<512x1xf32, #tpu.memory_space<vmem>>) attributes {dimension_semantics = [#tpu.dimension_semantics<parallel>], iteration_bounds = array<i64: 4>, scalar_prefetch = 0 : i64, scratch_operands = 0 : i64, tpu.core_type = #tpu.core_type<tc>, window_params = [{transform_indices = @transform_0, window_bounds = array<i64: 512, 128>}, {transform_indices = @transform_1, window_bounds = array<i64: 512, 128>}, {transform_indices = @transform_2, window_bounds = array<i64: 512, 1>}]} {
    %c0 = arith.constant 0 : index
    %c0_0 = arith.constant 0 : index
    %0 = vector.load %arg1[%c0, %c0_0] : memref<512x128xf32, #tpu.memory_space<vmem>>, vector<512x128xf32>
    %c0_1 = arith.constant 0 : index
    %c0_2 = arith.constant 0 : index
    %1 = vector.load %arg2[%c0_1, %c0_2] : memref<512x128xf32, #tpu.memory_space<vmem>>, vector<512x128xf32>
    %2 = arith.subf %0, %1 : vector<512x128xf32>
    %3 = arith.mulf %2, %2 : vector<512x128xf32>
    %cst = arith.constant dense<0.000000e+00> : vector<512xf32>
    %4 = vector.multi_reduction <add>, %3, %cst [1] : vector<512x128xf32> to vector<512xf32>
    %5 = vector.shape_cast %4 : vector<512xf32> to vector<512x1xf32>
    %cst_3 = arith.constant -5.000000e-03 : f32
    %6 = vector.broadcast %cst_3 : f32 to vector<512x1xf32>
    %7 = arith.mulf %5, %6 : vector<512x1xf32>
    %8 = math.exp %7 : vector<512x1xf32>
    %c0_4 = arith.constant 0 : index
    %c0_5 = arith.constant 0 : index
    %9 = vector.load %arg3[%c0_4, %c0_5] : memref<512x1xf32, #tpu.memory_space<vmem>>, vector<512x1xf32>
    tpu.vector_store %arg3[%c0_4, %c0_5], %8 {strides = array<i32>} : memref<512x1xf32, #tpu.memory_space<vmem>>, vector<512x1xf32>,
    return
  }
  func.func @transform_0(%arg0: i32) -> (i32, i32) {
    %c0_i32 = arith.constant 0 : i32
    %c0_i32_0 = arith.constant 0 : i32
    return %arg0, %c0_i32 : i32, i32
  }
  func.func @transform_1(%arg0: i32) -> (i32, i32) {
    %c0_i32 = arith.constant 0 : i32
    %c0_i32_0 = arith.constant 0 : i32
    return %arg0, %c0_i32 : i32, i32
  }
  func.func @transform_2(%arg0: i32) -> (i32, i32) {
    %c0_i32 = arith.constant 0 : i32
    %c0_i32_0 = arith.constant 0 : i32
    return %arg0, %c0_i32 : i32, i32
  }
}

</mosaic_0001>

<bundles_post_ra>
// kernel: gaussian_kernel.1
= control target key start
LH: loop header
LB: loop body
LE: loop exit
PB: predicated region body
PF: predicated region fallthrough
CT: control target
= control target key end

     0   :  { %7 = vsyncpa [#allocation3], 0  ;;  %s1671_s0 = inlined_call_operand.hbm [shape: f32[2048,128], index: 0, kind: input, shape index: {}]   ;;  %s1672_s1 = inlined_call_operand.hbm [shape: f32[2048,128], index: 1, kind: input, shape index: {}]   ;;  %s1673_s2 = inlined_call_operand.vmem [shape: f32[2048,1], index: 2, kind: output, shape index: {}]  }
   0x1   :  { %9 = vsyncpa [#allocation3 + $0x1], 0 }
   0x2   :  { %10 = vsyncpa [#allocation5], 0 }
   0x3   :  { %12 = vsyncpa [#allocation5 + $0x1], 0  ;;  %s1246_s9 = smov 0   ;;  %s1248_s10 = smov 0  }
   0x4   :  { %s1250_s11 = smov 0   ;;  %s1252_s12 = smov 0  }
   0x5 LB: > { %s938_s13 = sadd.s32 4294967295, %s1225_s12   ;;  %s1266_s14 = sadd.s32 1, %s1225_s12   ;;  %s1225_s12 = sphi %s1252_s12, %s1683_s12   ;;  %s1221_s11 = sphi %s1250_s11, %s1682_s11   ;;  %s1217_s10 = sphi %s1248_s10, %s1681_s10   ;;  %s1213_s9 = sphi %s1246_s9, %s1680_s9  }
   0x6   : > { %s22_s15 = ssub.s32 %s1225_s12, %s1266_s14  ;;  %s25_s16 = sadd.s32 1, %s1221_s11 }
   0x7   : > { %p23_p0 = scmp.eq.s32.totalorder %s22_s15, 0  ;;  %p32_p1 = scmp.ne.s32.totalorder %s1221_s11, %s1217_s10 }
   0x8   : > { %p33_p2 = scmp.eq.s32.totalorder %s1225_s12, 0  ;;  %p38_p3 = scmp.ne.s32.totalorder %s1217_s10, %s1213_s9 }
   0x9   : > { %s1276_s17 = scalar_select %p23_p0, %s1221_s11, %s25_s16  }
   0xa   : > { %p34_p4 = por %p33_p2, %p32_p1  ;;  %p39_p5 = scmp.eq.s32.totalorder %s938_s13, 0 }
   0xb   : > { %p968_p6 = scmp.lt.s32.totalorder %s1225_s12, 4  ;;  %s1286_s19 = sand.u32 1, %s1221_s11  }
   0xc   : > { %p1281_p7 = por %p39_p5, %p38_p3  ;;  %s942_s20 = sshll.u32 %s1286_s19, 9 }
   0xd   : > { %s955_s21 = sshll.u32 %s1225_s12, 13  ;;  %s118_s25 = scalar_lea.vmem [#allocation2], %s942_s20 }
   0xe   : > { %s1675_s18 = scalar_select %p1281_p7, 1, 0 }
   0xf   : > { %s1295_s24 = scalar_lea.hbm %s1671_s0, %s955_s21  ;;  %s125_s26 = sshll.u32 %s118_s25, 4  ;;  %s1299_s26 = int_to_ptr.vmem [resolvable:$true] %s125_s26 }
  0x10   : > { %p1301_p8 = pnand %p968_p6, %p34_p4  ;;  %s115_s28 = scalar_lea.sflag [#allocation3], %s1286_s19 }
  0x11   : > { %s1131_s29 = scalar_lea.hbm %s1295_s24, 8192  ;;  %s1136_s4 = scalar_lea.hbm %s1671_s0, 32768 }
  0x12   : > { %p1132_p10 = scmp.ne.s32.totalorder %s1295_s24, %s1131_s29  ;;  %p1133_p11 = pneg %p1301_p8 }
  0x13   : > { %p1137_p0 = scmp.lt.s32.totalorder %s1295_s24, %s1671_s0  ;;  %p1138_p1 = scmp.lt.s32.totalorder %s1136_s4, %s1131_s29 }
  0x14   : > { %p1134_p12 = pnand %p1133_p11, %p1132_p10 }
  0x15   : > { %p1139_p2 = por %p1138_p1, %p1137_p0 }
  0x16   : > { %p1135_p13 = pneg %p1134_p12 }
  0x18   : > { %p1140_p3 = pnand %p1139_p2, %p1135_p13 }
  0x1a   : > { %1143 = shalt.err (!%p1140_p3)
}
  0x1b   : > { %s1144_s7 = scalar_lea.vmem %s1299_s26, 8192  ;;  %s1227_s8 = smov [#allocation2]  }
  0x1c   : > { %p1145_p4 = scmp.ne.s32.totalorder %s1299_s26, %s1144_s7  ;;  %s1149_s9 = sshll.u32 %s1227_s8, 4  ;;  %s1150_s9 = int_to_ptr.vmem [resolvable:$false] %s1149_s9 }
  0x1d   : > { %s1151_s15 = scalar_lea.vmem %s1150_s9, 16384  ;;  %p1152_p10 = scmp.lt.s32.totalorder %s1299_s26, %s1150_s9 }
  0x1e   : > { %p1147_p5 = pnand %p1145_p4, %p1133_p11  ;;  %p1153_p12 = scmp.lt.s32.totalorder %s1151_s15, %s1144_s7 }
  0x20   : > { %p1148_p6 = pneg %p1147_p5  ;;  %p1154_p9 = por %p1153_p12, %p1152_p10 }
  0x22   : > { %p1155_p0 = pnand %p1154_p9, %p1148_p6 }
  0x24   : > { %1158 = shalt.err (!%p1155_p0)
}
  0x25   : > { %s1228_s16 = smov 128   ;;  %s1229_s22 = smov 8  }
  0x26   : > { %964 = dma.hbm_to_vmem [thread:$0]  (!%p1301_p8), %s1295_s24, 8192, %s1299_s26, %s115_s28, %s1228_s16, %s1228_s16, %s1229_s22  }
  0x27   : > { %p154_p9 = scmp.lt.s32.totalorder %s1225_s12, 5  ;;  %s1342_s29 = scalar_lea.hbm %s1672_s1, %s955_s21 }
  0x28   : > { %p1677_p13 = scmp.ge.s32.totalorder %s1225_s12, 1  ;;  %s139_s3 = scalar_lea.vmem [#allocation4], %s942_s20 }
  0x29   : > { %s146_s4 = sshll.u32 %s139_s3, 4  ;;  %s136_s24 = scalar_lea.sflag [#allocation5], %s1286_s19  ;;  %s1352_s4 = int_to_ptr.vmem [resolvable:$true] %s146_s4 }
  0x2a   : > { %p1346_p1 = pnand %p1677_p13, %p154_p9  ;;  %s1159_s26 = scalar_lea.hbm %s1342_s29, 8192 }
  0x2b   : > { %p1160_p2 = scmp.ne.s32.totalorder %s1342_s29, %s1159_s26  ;;  %s1164_s5 = scalar_lea.hbm %s1672_s1, 32768 }
  0x2c   : > { %p1165_p5 = scmp.lt.s32.totalorder %s1342_s29, %s1672_s1  ;;  %p1166_p6 = scmp.lt.s32.totalorder %s1164_s5, %s1159_s26 }
  0x2d   : > { %p1162_p3 = pnand %p1160_p2, %p1133_p11 }
  0x2e   : > { %p1167_p10 = por %p1166_p6, %p1165_p5 }
  0x2f   : > { %p1163_p4 = pneg %p1162_p3 }
  0x31   : > { %p1168_p12 = pnand %p1167_p10, %p1163_p4 }
  0x33   : > { %1171 = shalt.err (!%p1168_p12)
}
  0x34   : > { %s1172_s19 = scalar_lea.vmem %s1352_s4, 8192  ;;  %s1230_s20 = smov [#allocation4]  }
  0x35   : > { %p1173_p0 = scmp.ne.s32.totalorder %s1352_s4, %s1172_s19  ;;  %s1177_s8 = sshll.u32 %s1230_s20, 4  ;;  %s1178_s8 = int_to_ptr.vmem [resolvable:$false] %s1177_s8 }
  0x36   : > { %s1179_s9 = scalar_lea.vmem %s1178_s8, 16384  ;;  %p1180_p2 = scmp.lt.s32.totalorder %s1352_s4, %s1178_s8 }
  0x37   : > { %p1175_p9 = pnand %p1173_p0, %p1133_p11  ;;  %p1181_p3 = scmp.lt.s32.totalorder %s1179_s9, %s1172_s19 }
  0x39   : > { %p1176_p13 = pneg %p1175_p9  ;;  %p1182_p7 = por %p1181_p3, %p1180_p2 }
  0x3b   : > { %p1183_p5 = pnand %p1182_p7, %p1176_p13 }
  0x3d   : > { %1186 = shalt.err (!%p1183_p5)
}
  0x3e   : > { %967 = dma.hbm_to_vmem [thread:$0]  (!%p1301_p8), %s1342_s29, 8192, %s1352_s4, %s136_s24, %s1228_s16, %s1228_s16, %s1229_s22  }
  0x3f   : > { %158 = sbr.rel (%p1346_p1) target bundleno = 359 (0x167), region = 28  ;;  %s160_s15 = sand.u32 (!%p1346_p1), 1, %s1217_s10  }
  0x40   : > { %s949_s23 = sshll.u32 (!%p1346_p1), %s160_s15, 9  ;;  %s161_s25 = scalar_lea.sflag (!%p1346_p1), [#allocation3], %s160_s15 }
  0x41   : > { %s1383_s3 = scalar_lea.vmem (!%p1346_p1), [#allocation2], %s949_s23  ;;  %p1679_p7 = scmp.ne.s32.totalorder (!%p1346_p1), %s1675_s18, 0 }
  0x44   : > { %1204 = dma.done.wait (%p1679_p7), %s161_s25, 8192  }
  0x45   : > { %1206 = vsyncadd (%p1679_p7), %s161_s25, 4294959104  ;;  %s170_s27 = scalar_lea.sflag [#allocation5], %s160_s15  ;;  %s1389_s26 = scalar_lea.vmem [#allocation4], %s949_s23 }
  0x46   : > { %1208 = dma.done.wait (%p1679_p7), %s170_s27, 8192  }
  0x47   : > { %1210 = vsyncadd (%p1679_p7), %s170_s27, 4294959104  ;;  %v209_v0 = vld [vmem:[%s1383_s3 + $0x10] sm:$0xff]  ;;  %v207_v2 = vld [vmem:[%s1383_s3] sm:$0xff]  ;;  %s951_s18 = sshll.u32 %s938_s13, 6  ;;  %vm783_vm0 = vcmask 7168  }
  0x48   : > { %v273_v1 = vld [vmem:[%s1389_s26 + $0x10] sm:$0xff]  ;;  %v271_v4 = vld [vmem:[%s1389_s26] sm:$0xff]  ;;  %v210_v5 = vld [vmem:[%s1383_s3 + $0x18] sm:$0xff]  ;;  %p202_p8 = scmp.lt.s32.totalorder %s951_s18, 255 }
  0x49   : > { %v337_v3 = vsub.f32 %v209_v0, %v273_v1  ;;  %v274_v6 = vld [vmem:[%s1389_s26 + $0x18] sm:$0xff]  ;;  %v335_v7 = vsub.f32 %v207_v2, %v271_v4  ;;  %v208_v9 = vld [vmem:[%s1383_s3 + $0x8] sm:$0xff]  ;;  %v211_v15 = vld [vmem:[%s1383_s3 + $0x20] sm:$0xff] }
  0x4a   : > { %v338_v8 = vsub.f32 %v210_v5, %v274_v6  ;;  %v272_v10 = vld [vmem:[%s1389_s26 + $0x8] sm:$0xff]  ;;  %v275_v16 = vld [vmem:[%s1389_s26 + $0x20] sm:$0xff]  ;;  %v214_v22 = vld [vmem:[%s1383_s3 + $0x38] sm:$0xff]  ;;  %s1685_s18 = smov (!%p202_p8, %s951_s18), 255 }
  0x4b   : > { %v212_v11 = vld [vmem:[%s1383_s3 + $0x28] sm:$0xff]  ;;  %v401_v12 = vmul.f32 %v337_v3, %v337_v3  ;;  %v336_v13 = vsub.f32 %v208_v9, %v272_v10  ;;  %v399_v17 = vmul.f32 %v335_v7, %v335_v7  ;;  %v339_v21 = vsub.f32 %v211_v15, %v275_v16  ;;  %v278_v23 = vld [vmem:[%s1389_s26 + $0x38] sm:$0xff]  ;;  %v213_v24 = vld [vmem:[%s1383_s3 + $0x30] sm:$0xff]  ;;  %s952_s12 = sshll.u32 %s1685_s18, 3 }
  0x4c   : > { %v276_v14 = vld [vmem:[%s1389_s26 + $0x28] sm:$0xff]  ;;  %v402_v18 = vmul.f32 %v338_v8, %v338_v8  ;;  %v277_v25 = vld [vmem:[%s1389_s26 + $0x30] sm:$0xff]  ;;  %v342_v27 = vsub.f32 %v214_v22, %v278_v23  ;;  %v215_v32 = vld [vmem:[%s1383_s3 + $0x40] sm:$0xff]  ;;  %s1528_s22 = scalar_lea.vmem %s1673_s2, %s952_s12 }
  0x4d   : > { %467 = vadd.xlane.f32.xlu1 %v401_v12  ;;  %v340_v19 = vsub.f32 %v212_v11, %v276_v14  ;;  %463 = vadd.xlane.f32.xlu0 %v399_v17  ;;  %v400_v20 = vmul.f32 %v336_v13, %v336_v13  ;;  %v403_v28 = vmul.f32 %v339_v21, %v339_v21  ;;  %v216_v30 = vld [vmem:[%s1383_s3 + $0x48] sm:$0xff]  ;;  %v279_v33 = vld [vmem:[%s1389_s26 + $0x40] sm:$0xff]  ;;  %v218_v38 = vld [vmem:[%s1383_s3 + $0x58] sm:$0xff] }
  0x4e   : > { %v341_v29 = vsub.f32 %v213_v24, %v277_v25  ;;  %v280_v31 = vld [vmem:[%s1389_s26 + $0x48] sm:$0xff]  ;;  %v406_v34 = vmul.f32 %v342_v27, %v342_v27  ;;  %v343_v37 = vsub.f32 %v215_v32, %v279_v33  ;;  %v282_v39 = vld [vmem:[%s1389_s26 + $0x58] sm:$0xff]  ;;  %v217_v40 = vld [vmem:[%s1383_s3 + $0x50] sm:$0xff] }
  0x4f   : > { %v404_v26 = vmul.f32 %v340_v19, %v340_v19  ;;  %v344_v35 = vsub.f32 %v216_v30, %v280_v31  ;;  %v281_v41 = vld [vmem:[%s1389_s26 + $0x50] sm:$0xff]  ;;  %v346_v43 = vsub.f32 %v218_v38, %v282_v39  ;;  %v220_v46 = vld [vmem:[%s1383_s3 + $0x68] sm:$0xff]  ;;  %v219_v48 = vld [vmem:[%s1383_s3 + $0x60] sm:$0xff] }
  0x50   : > { %v405_v36 = vmul.f32 %v341_v29, %v341_v29  ;;  %v407_v44 = vmul.f32 %v343_v37, %v343_v37  ;;  %v345_v45 = vsub.f32 %v217_v40, %v281_v41  ;;  %v284_v47 = vld [vmem:[%s1389_s26 + $0x68] sm:$0xff]  ;;  %v283_v49 = vld [vmem:[%s1389_s26 + $0x60] sm:$0xff]  ;;  %v222_v54 = vld [vmem:[%s1383_s3 + $0x78] sm:$0xff] }
  0x51   : > { %469 = vadd.xlane.f32.xlu1 %v402_v18  ;;  %465 = vadd.xlane.f32.xlu0 %v400_v20  ;;  %v408_v42 = vmul.f32 %v344_v35, %v344_v35  ;;  %v410_v50 = vmul.f32 %v346_v43, %v346_v43  ;;  %v348_v51 = vsub.f32 %v220_v46, %v284_v47  ;;  %v286_v55 = vld [vmem:[%s1389_s26 + $0x78] sm:$0xff]  ;;  %v221_v56 = vld [vmem:[%s1383_s3 + $0x70] sm:$0xff]  ;;  %v224_v62 = vld [vmem:[%s1383_s3 + $0x88] sm:$0xff] }
  0x52   : > { %v409_v52 = vmul.f32 %v345_v45, %v345_v45  ;;  %v347_v53 = vsub.f32 %v219_v48, %v283_v49  ;;  %v285_v57 = vld [vmem:[%s1389_s26 + $0x70] sm:$0xff]  ;;  %v350_v59 = vsub.f32 %v222_v54, %v286_v55  ;;  %v288_v63 = vld [vmem:[%s1389_s26 + $0x88] sm:$0xff]  ;;  %v223_v0 = vld [vmem:[%s1383_s3 + $0x80] sm:$0xff] }
  0x53   : > { %v412_v58 = vmul.f32 %v348_v51, %v348_v51  ;;  %v349_v61 = vsub.f32 %v221_v56, %v285_v57  ;;  %v287_v1 = vld [vmem:[%s1389_s26 + $0x80] sm:$0xff]  ;;  %v352_v3 = vsub.f32 %v224_v62, %v288_v63  ;;  %v226_v6 = vld [vmem:[%s1383_s3 + $0x98] sm:$0xff]  ;;  %v225_v8 = vld [vmem:[%s1383_s3 + $0x90] sm:$0xff] }
  0x54   : > { %v411_v60 = vmul.f32 %v347_v53, %v347_v53  ;;  %v414_v2 = vmul.f32 %v350_v59, %v350_v59  ;;  %v351_v5 = vsub.f32 %v223_v0, %v287_v1  ;;  %v290_v7 = vld [vmem:[%s1389_s26 + $0x98] sm:$0xff]  ;;  %v289_v9 = vld [vmem:[%s1389_s26 + $0x90] sm:$0xff]  ;;  %v228_v14 = vld [vmem:[%s1383_s3 + $0xa8] sm:$0xff] }
  0x55   : > { %473 = vadd.xlane.f32.xlu1 %v404_v26  ;;  %471 = vadd.xlane.f32.xlu0 %v403_v28  ;;  %v413_v4 = vmul.f32 %v349_v61, %v349_v61  ;;  %v416_v10 = vmul.f32 %v352_v3, %v352_v3  ;;  %v354_v11 = vsub.f32 %v226_v6, %v290_v7  ;;  %v292_v15 = vld [vmem:[%s1389_s26 + $0xa8] sm:$0xff]  ;;  %v227_v16 = vld [vmem:[%s1383_s3 + $0xa0] sm:$0xff]  ;;  %v230_v22 = vld [vmem:[%s1383_s3 + $0xb8] sm:$0xff] }
  0x56   : > { %v415_v12 = vmul.f32 %v351_v5, %v351_v5  ;;  %v353_v13 = vsub.f32 %v225_v8, %v289_v9  ;;  %v291_v17 = vld [vmem:[%s1389_s26 + $0xa0] sm:$0xff]  ;;  %v356_v19 = vsub.f32 %v228_v14, %v292_v15  ;;  %v294_v23 = vld [vmem:[%s1389_s26 + $0xb8] sm:$0xff]  ;;  %v229_v24 = vld [vmem:[%s1383_s3 + $0xb0] sm:$0xff] }
  0x57   : > { %v418_v18 = vmul.f32 %v354_v11, %v354_v11  ;;  %v355_v21 = vsub.f32 %v227_v16, %v291_v17  ;;  %v293_v25 = vld [vmem:[%s1389_s26 + $0xb0] sm:$0xff]  ;;  %v358_v27 = vsub.f32 %v230_v22, %v294_v23  ;;  %v232_v30 = vld [vmem:[%s1383_s3 + $0xc8] sm:$0xff]  ;;  %v231_v32 = vld [vmem:[%s1383_s3 + $0xc0] sm:$0xff] }
  0x58   : > { %v417_v20 = vmul.f32 %v353_v13, %v353_v13  ;;  %v420_v26 = vmul.f32 %v356_v19, %v356_v19  ;;  %v357_v29 = vsub.f32 %v229_v24, %v293_v25  ;;  %v296_v31 = vld [vmem:[%s1389_s26 + $0xc8] sm:$0xff]  ;;  %v295_v33 = vld [vmem:[%s1389_s26 + $0xc0] sm:$0xff]  ;;  %v234_v38 = vld [vmem:[%s1383_s3 + $0xd8] sm:$0xff] }
  0x59   : > { %477 = vadd.xlane.f32.xlu1 %v406_v34  ;;  %475 = vadd.xlane.f32.xlu0 %v405_v36  ;;  %v419_v28 = vmul.f32 %v355_v21, %v355_v21  ;;  %v422_v34 = vmul.f32 %v358_v27, %v358_v27  ;;  %v360_v35 = vsub.f32 %v232_v30, %v296_v31  ;;  %v298_v39 = vld [vmem:[%s1389_s26 + $0xd8] sm:$0xff]  ;;  %v233_v40 = vld [vmem:[%s1383_s3 + $0xd0] sm:$0xff]  ;;  %v236_v46 = vld [vmem:[%s1383_s3 + $0xe8] sm:$0xff] }
  0x5a   : > { %v421_v36 = vmul.f32 %v357_v29, %v357_v29  ;;  %v359_v37 = vsub.f32 %v231_v32, %v295_v33  ;;  %v297_v41 = vld [vmem:[%s1389_s26 + $0xd0] sm:$0xff]  ;;  %v362_v43 = vsub.f32 %v234_v38, %v298_v39  ;;  %v300_v47 = vld [vmem:[%s1389_s26 + $0xe8] sm:$0xff]  ;;  %v235_v48 = vld [vmem:[%s1383_s3 + $0xe0] sm:$0xff] }
  0x5b   : > { %v361_v45 = vsub.f32 %v233_v40, %v297_v41  ;;  %v299_v49 = vld [vmem:[%s1389_s26 + $0xe0] sm:$0xff]  ;;  %v364_v51 = vsub.f32 %v236_v46, %v300_v47  ;;  %v238_v54 = vld [vmem:[%s1383_s3 + $0xf8] sm:$0xff]  ;;  %v237_v56 = vld [vmem:[%s1383_s3 + $0xf0] sm:$0xff] }
  0x5c   : > { %v363_v53 = vsub.f32 %v235_v48, %v299_v49  ;;  %v302_v55 = vld [vmem:[%s1389_s26 + $0xf8] sm:$0xff]  ;;  %v301_v57 = vld [vmem:[%s1389_s26 + $0xf0] sm:$0xff]  ;;  %v240_v62 = vld [vmem:[%s1383_s3 + $0x108] sm:$0xff] }
  0x5d   : > { %481 = vadd.xlane.f32.xlu1 %v408_v42  ;;  %479 = vadd.xlane.f32.xlu0 %v407_v44  ;;  %v424_v42 = vmul.f32 %v360_v35, %v360_v35  ;;  %v423_v44 = vmul.f32 %v359_v37, %v359_v37  ;;  %v366_v59 = vsub.f32 %v238_v54, %v302_v55  ;;  %v304_v63 = vld [vmem:[%s1389_s26 + $0x108] sm:$0xff]  ;;  %v239_v0 = vld [vmem:[%s1383_s3 + $0x100] sm:$0xff]  ;;  %v242_v6 = vld [vmem:[%s1383_s3 + $0x118] sm:$0xff] }
  0x5e   : > { %v365_v61 = vsub.f32 %v237_v56, %v301_v57  ;;  %v303_v1 = vld [vmem:[%s1389_s26 + $0x100] sm:$0xff]  ;;  %v368_v3 = vsub.f32 %v240_v62, %v304_v63  ;;  %v306_v7 = vld [vmem:[%s1389_s26 + $0x118] sm:$0xff]  ;;  %v241_v8 = vld [vmem:[%s1383_s3 + $0x110] sm:$0xff] }
  0x5f   : > { %v367_v5 = vsub.f32 %v239_v0, %v303_v1  ;;  %v305_v9 = vld [vmem:[%s1389_s26 + $0x110] sm:$0xff]  ;;  %v370_v11 = vsub.f32 %v242_v6, %v306_v7  ;;  %v244_v14 = vld [vmem:[%s1383_s3 + $0x128] sm:$0xff]  ;;  %v243_v16 = vld [vmem:[%s1383_s3 + $0x120] sm:$0xff] }
  0x60   : > { %v369_v13 = vsub.f32 %v241_v8, %v305_v9  ;;  %v308_v15 = vld [vmem:[%s1389_s26 + $0x128] sm:$0xff]  ;;  %v307_v17 = vld [vmem:[%s1389_s26 + $0x120] sm:$0xff]  ;;  %v246_v22 = vld [vmem:[%s1383_s3 + $0x138] sm:$0xff] }
  0x61   : > { %485 = vadd.xlane.f32.xlu1 %v410_v50  ;;  %483 = vadd.xlane.f32.xlu0 %v409_v52  ;;  %v426_v50 = vmul.f32 %v362_v43, %v362_v43  ;;  %v425_v52 = vmul.f32 %v361_v45, %v361_v45  ;;  %v372_v19 = vsub.f32 %v244_v14, %v308_v15  ;;  %v310_v23 = vld [vmem:[%s1389_s26 + $0x138] sm:$0xff]  ;;  %v245_v24 = vld [vmem:[%s1383_s3 + $0x130] sm:$0xff]  ;;  %v248_v30 = vld [vmem:[%s1383_s3 + $0x148] sm:$0xff] }
  0x62   : > { %v371_v21 = vsub.f32 %v243_v16, %v307_v17  ;;  %v309_v25 = vld [vmem:[%s1389_s26 + $0x130] sm:$0xff]  ;;  %v374_v27 = vsub.f32 %v246_v22, %v310_v23  ;;  %v312_v31 = vld [vmem:[%s1389_s26 + $0x148] sm:$0xff]  ;;  %v247_v32 = vld [vmem:[%s1383_s3 + $0x140] sm:$0xff] }
  0x63   : > { %v373_v29 = vsub.f32 %v245_v24, %v309_v25  ;;  %v311_v33 = vld [vmem:[%s1389_s26 + $0x140] sm:$0xff]  ;;  %v376_v35 = vsub.f32 %v248_v30, %v312_v31  ;;  %v250_v38 = vld [vmem:[%s1383_s3 + $0x158] sm:$0xff]  ;;  %v249_v40 = vld [vmem:[%s1383_s3 + $0x150] sm:$0xff] }
  0x64   : > { %v375_v37 = vsub.f32 %v247_v32, %v311_v33  ;;  %v314_v39 = vld [vmem:[%s1389_s26 + $0x158] sm:$0xff]  ;;  %v313_v41 = vld [vmem:[%s1389_s26 + $0x150] sm:$0xff]  ;;  %v252_v46 = vld [vmem:[%s1383_s3 + $0x168] sm:$0xff] }
  0x65   : > { %489 = vadd.xlane.f32.xlu1 %v412_v58  ;;  %487 = vadd.xlane.f32.xlu0 %v411_v60  ;;  %v428_v58 = vmul.f32 %v364_v51, %v364_v51  ;;  %v427_v60 = vmul.f32 %v363_v53, %v363_v53  ;;  %v378_v43 = vsub.f32 %v250_v38, %v314_v39  ;;  %v316_v47 = vld [vmem:[%s1389_s26 + $0x168] sm:$0xff]  ;;  %v251_v48 = vld [vmem:[%s1383_s3 + $0x160] sm:$0xff]  ;;  %v254_v54 = vld [vmem:[%s1383_s3 + $0x178] sm:$0xff] }
  0x66   : > { %v377_v45 = vsub.f32 %v249_v40, %v313_v41  ;;  %v315_v49 = vld [vmem:[%s1389_s26 + $0x160] sm:$0xff]  ;;  %v380_v51 = vsub.f32 %v252_v46, %v316_v47  ;;  %v318_v55 = vld [vmem:[%s1389_s26 + $0x178] sm:$0xff]  ;;  %v253_v56 = vld [vmem:[%s1383_s3 + $0x170] sm:$0xff] }
  0x67   : > { %v379_v53 = vsub.f32 %v251_v48, %v315_v49  ;;  %v317_v57 = vld [vmem:[%s1389_s26 + $0x170] sm:$0xff]  ;;  %v256_v62 = vld [vmem:[%s1383_s3 + $0x188] sm:$0xff]  ;;  %v255_v0 = vld [vmem:[%s1383_s3 + $0x180] sm:$0xff] }
  0x68   : > { %v320_v63 = vld [vmem:[%s1389_s26 + $0x188] sm:$0xff]  ;;  %v319_v1 = vld [vmem:[%s1389_s26 + $0x180] sm:$0xff]  ;;  %v258_v6 = vld [vmem:[%s1383_s3 + $0x198] sm:$0xff] }
  0x69   : > { %493 = vadd.xlane.f32.xlu1 %v414_v2  ;;  %491 = vadd.xlane.f32.xlu0 %v413_v4  ;;  %v430_v2 = vmul.f32 %v366_v59, %v366_v59  ;;  %v429_v4 = vmul.f32 %v365_v61, %v365_v61  ;;  %v382_v59 = vsub.f32 %v254_v54, %v318_v55  ;;  %v322_v7 = vld [vmem:[%s1389_s26 + $0x198] sm:$0xff]  ;;  %v257_v8 = vld [vmem:[%s1383_s3 + $0x190] sm:$0xff]  ;;  %v260_v14 = vld [vmem:[%s1383_s3 + $0x1a8] sm:$0xff] }
  0x6a   : > { %v381_v61 = vsub.f32 %v253_v56, %v317_v57  ;;  %v321_v9 = vld [vmem:[%s1389_s26 + $0x190] sm:$0xff]  ;;  %v324_v15 = vld [vmem:[%s1389_s26 + $0x1a8] sm:$0xff]  ;;  %v259_v16 = vld [vmem:[%s1383_s3 + $0x1a0] sm:$0xff] }
  0x6b   : > { %v323_v17 = vld [vmem:[%s1389_s26 + $0x1a0] sm:$0xff]  ;;  %v262_v22 = vld [vmem:[%s1383_s3 + $0x1b8] sm:$0xff]  ;;  %v261_v24 = vld [vmem:[%s1383_s3 + $0x1b0] sm:$0xff] }
  0x6c   : > { %v326_v23 = vld [vmem:[%s1389_s26 + $0x1b8] sm:$0xff]  ;;  %v325_v25 = vld [vmem:[%s1389_s26 + $0x1b0] sm:$0xff]  ;;  %v264_v30 = vld [vmem:[%s1383_s3 + $0x1c8] sm:$0xff] }
  0x6d   : > { %497 = vadd.xlane.f32.xlu1 %v416_v10  ;;  %495 = vadd.xlane.f32.xlu0 %v415_v12  ;;  %v432_v10 = vmul.f32 %v368_v3, %v368_v3  ;;  %v431_v12 = vmul.f32 %v367_v5, %v367_v5  ;;  %v384_v3 = vsub.f32 %v256_v62, %v320_v63  ;;  %v328_v31 = vld [vmem:[%s1389_s26 + $0x1c8] sm:$0xff]  ;;  %v263_v32 = vld [vmem:[%s1383_s3 + $0x1c0] sm:$0xff]  ;;  %v266_v38 = vld [vmem:[%s1383_s3 + $0x1d8] sm:$0xff] }
  0x6e   : > { %v383_v5 = vsub.f32 %v255_v0, %v319_v1  ;;  %v327_v33 = vld [vmem:[%s1389_s26 + $0x1c0] sm:$0xff]  ;;  %v330_v39 = vld [vmem:[%s1389_s26 + $0x1d8] sm:$0xff]  ;;  %v265_v40 = vld [vmem:[%s1383_s3 + $0x1d0] sm:$0xff] }
  0x6f   : > { %v329_v41 = vld [vmem:[%s1389_s26 + $0x1d0] sm:$0xff]  ;;  %v268_v46 = vld [vmem:[%s1383_s3 + $0x1e8] sm:$0xff]  ;;  %v267_v48 = vld [vmem:[%s1383_s3 + $0x1e0] sm:$0xff] }
  0x70   : > { %v332_v47 = vld [vmem:[%s1389_s26 + $0x1e8] sm:$0xff]  ;;  %v331_v49 = vld [vmem:[%s1389_s26 + $0x1e0] sm:$0xff]  ;;  %v270_v54 = vld [vmem:[%s1383_s3 + $0x1f8] sm:$0xff] }
  0x71   : > { %501 = vadd.xlane.f32.xlu1 %v418_v18  ;;  %499 = vadd.xlane.f32.xlu0 %v417_v20  ;;  %v434_v18 = vmul.f32 %v370_v11, %v370_v11  ;;  %v433_v20 = vmul.f32 %v369_v13, %v369_v13  ;;  %v386_v11 = vsub.f32 %v258_v6, %v322_v7  ;;  %v334_v55 = vld [vmem:[%s1389_s26 + $0x1f8] sm:$0xff]  ;;  %v269_v56 = vld [vmem:[%s1383_s3 + $0x1f0] sm:$0xff] }
  0x72   : > { %v385_v13 = vsub.f32 %v257_v8, %v321_v9  ;;  %v333_v57 = vld [vmem:[%s1389_s26 + $0x1f0] sm:$0xff] }
  0x75   : > { %505 = vadd.xlane.f32.xlu1 %v420_v26  ;;  %503 = vadd.xlane.f32.xlu0 %v419_v28  ;;  %v436_v26 = vmul.f32 %v372_v19, %v372_v19  ;;  %v435_v28 = vmul.f32 %v371_v21, %v371_v21  ;;  %v388_v19 = vsub.f32 %v260_v14, %v324_v15 }
  0x76   : > { %v387_v21 = vsub.f32 %v259_v16, %v323_v17 }
  0x79   : > { %509 = vadd.xlane.f32.xlu1 %v422_v34  ;;  %507 = vadd.xlane.f32.xlu0 %v421_v36  ;;  %v438_v34 = vmul.f32 %v374_v27, %v374_v27  ;;  %v437_v36 = vmul.f32 %v373_v29, %v373_v29  ;;  %v390_v27 = vsub.f32 %v262_v22, %v326_v23 }
  0x7a   : > { %v389_v29 = vsub.f32 %v261_v24, %v325_v25 }
  0x7d   : > { %513 = vadd.xlane.f32.xlu1 %v424_v42  ;;  %511 = vadd.xlane.f32.xlu0 %v423_v44  ;;  %v440_v42 = vmul.f32 %v376_v35, %v376_v35  ;;  %v439_v44 = vmul.f32 %v375_v37, %v375_v37  ;;  %v392_v35 = vsub.f32 %v264_v30, %v328_v31 }
  0x7e   : > { %v391_v37 = vsub.f32 %v263_v32, %v327_v33 }
  0x81   : > { %517 = vadd.xlane.f32.xlu1 %v426_v50  ;;  %515 = vadd.xlane.f32.xlu0 %v425_v52  ;;  %v442_v50 = vmul.f32 %v378_v43, %v378_v43  ;;  %v441_v52 = vmul.f32 %v377_v45, %v377_v45  ;;  %v394_v43 = vsub.f32 %v266_v38, %v330_v39 }
  0x82   : > { %v393_v45 = vsub.f32 %v265_v40, %v329_v41 }
  0x85   : > { %521 = vadd.xlane.f32.xlu1 %v428_v58  ;;  %519 = vadd.xlane.f32.xlu0 %v427_v60  ;;  %v444_v58 = vmul.f32 %v380_v51, %v380_v51  ;;  %v443_v60 = vmul.f32 %v379_v53, %v379_v53  ;;  %v396_v51 = vsub.f32 %v268_v46, %v332_v47 }
  0x86   : > { %v395_v53 = vsub.f32 %v267_v48, %v331_v49 }
  0x89   : > { %525 = vadd.xlane.f32.xlu1 %v430_v2  ;;  %523 = vadd.xlane.f32.xlu0 %v429_v4  ;;  %v446_v2 = vmul.f32 %v382_v59, %v382_v59  ;;  %v445_v4 = vmul.f32 %v381_v61, %v381_v61  ;;  %v398_v59 = vsub.f32 %v270_v54, %v334_v55 }
  0x8a   : > { %v397_v61 = vsub.f32 %v269_v56, %v333_v57 }
  0x8b   : > { %v462_v62 = vmul.f32 %v398_v59, %v398_v59 }
  0x8c   : > { %v461_v63 = vmul.f32 %v397_v61, %v397_v61 }
  0x8d   : > { %529 = vadd.xlane.f32.xlu1 %v432_v10  ;;  %527 = vadd.xlane.f32.xlu0 %v431_v12  ;;  %v448_v10 = vmul.f32 %v384_v3, %v384_v3  ;;  %v447_v12 = vmul.f32 %v383_v5, %v383_v5 }
  0x91   : > { %533 = vadd.xlane.f32.xlu1 %v434_v18  ;;  %531 = vadd.xlane.f32.xlu0 %v433_v20  ;;  %v450_v18 = vmul.f32 %v386_v11, %v386_v11  ;;  %v449_v20 = vmul.f32 %v385_v13, %v385_v13 }
  0x95   : > { %537 = vadd.xlane.f32.xlu1 %v436_v26  ;;  %535 = vadd.xlane.f32.xlu0 %v435_v28  ;;  %v452_v26 = vmul.f32 %v388_v19, %v388_v19  ;;  %v451_v28 = vmul.f32 %v387_v21, %v387_v21 }
  0x99   : > { %541 = vadd.xlane.f32.xlu1 %v438_v34  ;;  %539 = vadd.xlane.f32.xlu0 %v437_v36  ;;  %v454_v34 = vmul.f32 %v390_v27, %v390_v27  ;;  %v453_v36 = vmul.f32 %v389_v29, %v389_v29 }
  0x9d   : > { %545 = vadd.xlane.f32.xlu1 %v440_v42  ;;  %543 = vadd.xlane.f32.xlu0 %v439_v44  ;;  %v456_v42 = vmul.f32 %v392_v35, %v392_v35  ;;  %v455_v44 = vmul.f32 %v391_v37, %v391_v37 }
  0xa1   : > { %549 = vadd.xlane.f32.xlu1 %v442_v50  ;;  %547 = vadd.xlane.f32.xlu0 %v441_v52  ;;  %v458_v50 = vmul.f32 %v394_v43, %v394_v43  ;;  %v457_v52 = vmul.f32 %v393_v45, %v393_v45 }
  0xa5   : > { %553 = vadd.xlane.f32.xlu1 %v444_v58  ;;  %551 = vadd.xlane.f32.xlu0 %v443_v60  ;;  %v460_v58 = vmul.f32 %v396_v51, %v396_v51  ;;  %v459_v60 = vmul.f32 %v395_v53, %v395_v53 }
  0xa9   : > { %557 = vadd.xlane.f32.xlu1 %v446_v2  ;;  %555 = vadd.xlane.f32.xlu0 %v445_v4 }
  0xad   : > { %561 = vadd.xlane.f32.xlu1 %v448_v10  ;;  %559 = vadd.xlane.f32.xlu0 %v447_v12 }
  0xb1   : > { %565 = vadd.xlane.f32.xlu1 %v450_v18  ;;  %563 = vadd.xlane.f32.xlu0 %v449_v20 }
  0xb5   : > { %569 = vadd.xlane.f32.xlu1 %v452_v26  ;;  %567 = vadd.xlane.f32.xlu0 %v451_v28 }
  0xb9   : > { %573 = vadd.xlane.f32.xlu1 %v454_v34  ;;  %571 = vadd.xlane.f32.xlu0 %v453_v36 }
  0xbd   : > { %577 = vadd.xlane.f32.xlu1 %v456_v42  ;;  %575 = vadd.xlane.f32.xlu0 %v455_v44 }
  0xc1   : > { %581 = vadd.xlane.f32.xlu1 %v458_v50  ;;  %579 = vadd.xlane.f32.xlu0 %v457_v52 }
  0xc5   : > { %585 = vadd.xlane.f32.xlu1 %v460_v58  ;;  %583 = vadd.xlane.f32.xlu0 %v459_v60 }
  0xc9   : > { %589 = vadd.xlane.f32.xlu1 %v462_v62  ;;  %587 = vadd.xlane.f32.xlu0 %v461_v63 }
  0xd6   : > { %v468_v0 = vpop.xlane.xlu1 %467  ;;  %v464_v2 = vpop.xlane.xlu0 %463 }
  0xd7   : > { %v593_v1 = vmul.f32 -0.005, %v468_v0  ;;  %v591_v3 = vmul.f32 -0.005, %v464_v2 }
  0xd9   : > { %v659_v4 = vmul.f32 1.442695, %v593_v1  ;;  %v655_v5 = vmul.f32 1.442695, %v591_v3 }
  0xda   : > { %v470_v6 = vpop.xlane.xlu1 %469  ;;  %v466_v8 = vpop.xlane.xlu0 %465 }
  0xdb   : > { %1003 = vpow2.f32 %v659_v4  ;;  %v594_v7 = vmul.f32 -0.005, %v470_v6  ;;  %v592_v9 = vmul.f32 -0.005, %v466_v8 }
  0xdc   : > { %1005 = vpow2.f32 %v655_v5 }
  0xdd   : > { %v661_v10 = vmul.f32 1.442695, %v594_v7  ;;  %v657_v11 = vmul.f32 1.442695, %v592_v9 }
  0xde   : > { %v474_v12 = vpop.xlane.xlu1 %473  ;;  %v472_v14 = vpop.xlane.xlu0 %471 }
  0xdf   : > { %1007 = vpow2.f32 %v661_v10  ;;  %v596_v13 = vmul.f32 -0.005, %v474_v12  ;;  %v595_v15 = vmul.f32 -0.005, %v472_v14 }
  0xe0   : > { %1009 = vpow2.f32 %v657_v11 }
  0xe1   : > { %v665_v16 = vmul.f32 1.442695, %v596_v13  ;;  %v663_v17 = vmul.f32 1.442695, %v595_v15 }
  0xe2   : > { %v478_v18 = vpop.xlane.xlu1 %477  ;;  %v476_v20 = vpop.xlane.xlu0 %475 }
  0xe3   : > { %1011 = vpow2.f32 %v665_v16  ;;  %v598_v19 = vmul.f32 -0.005, %v478_v18  ;;  %v597_v21 = vmul.f32 -0.005, %v476_v20 }
  0xe4   : > { %1013 = vpow2.f32 %v663_v17 }
  0xe5   : > { %v669_v22 = vmul.f32 1.442695, %v598_v19  ;;  %v667_v23 = vmul.f32 1.442695, %v597_v21 }
  0xe6   : > { %v482_v24 = vpop.xlane.xlu1 %481  ;;  %v480_v26 = vpop.xlane.xlu0 %479 }
  0xe7   : > { %1015 = vpow2.f32 %v669_v22  ;;  %v600_v25 = vmul.f32 -0.005, %v482_v24  ;;  %v599_v28 = vmul.f32 -0.005, %v480_v26 }
  0xe8   : > { %v1004_v27 = vpop.eup %1003  ;;  %1017 = vpow2.f32 %v667_v23 }
  0xe9   : > { %v1006_v29 = vpop.eup %1005  ;;  %786 = vst.msk [vmem:[%s1528_s22 + $0x10] sm:$0xff] %vm783_vm0, %v1004_v27  ;;  %v673_v30 = vmul.f32 1.442695, %v600_v25  ;;  %v671_v31 = vmul.f32 1.442695, %v599_v28 }
  0xea   : > { %784 = vst.msk [vmem:[%s1528_s22] sm:$0xff] %vm783_vm0, %v1006_v29  ;;  %v486_v32 = vpop.xlane.xlu1 %485  ;;  %v484_v34 = vpop.xlane.xlu0 %483 }
  0xeb   : > { %1019 = vpow2.f32 %v673_v30  ;;  %v602_v33 = vmul.f32 -0.005, %v486_v32  ;;  %v601_v36 = vmul.f32 -0.005, %v484_v34 }
  0xec   : > { %v1008_v35 = vpop.eup %1007  ;;  %1021 = vpow2.f32 %v671_v31 }
  0xed   : > { %v1010_v37 = vpop.eup %1009  ;;  %787 = vst.msk [vmem:[%s1528_s22 + $0x18] sm:$0xff] %vm783_vm0, %v1008_v35  ;;  %v677_v38 = vmul.f32 1.442695, %v602_v33  ;;  %v675_v39 = vmul.f32 1.442695, %v601_v36 }
  0xee   : > { %785 = vst.msk [vmem:[%s1528_s22 + $0x8] sm:$0xff] %vm783_vm0, %v1010_v37  ;;  %v490_v40 = vpop.xlane.xlu1 %489  ;;  %v488_v42 = vpop.xlane.xlu0 %487 }
  0xef   : > { %1023 = vpow2.f32 %v677_v38  ;;  %v604_v41 = vmul.f32 -0.005, %v490_v40  ;;  %v603_v44 = vmul.f32 -0.005, %v488_v42 }
  0xf0   : > { %v1012_v43 = vpop.eup %1011  ;;  %1025 = vpow2.f32 %v675_v39 }
  0xf1   : > { %v1014_v45 = vpop.eup %1013  ;;  %789 = vst.msk [vmem:[%s1528_s22 + $0x28] sm:$0xff] %vm783_vm0, %v1012_v43  ;;  %v681_v46 = vmul.f32 1.442695, %v604_v41  ;;  %v679_v47 = vmul.f32 1.442695, %v603_v44 }
  0xf2   : > { %788 = vst.msk [vmem:[%s1528_s22 + $0x20] sm:$0xff] %vm783_vm0, %v1014_v45  ;;  %v494_v48 = vpop.xlane.xlu1 %493  ;;  %v492_v50 = vpop.xlane.xlu0 %491 }
  0xf3   : > { %1027 = vpow2.f32 %v681_v46  ;;  %v606_v49 = vmul.f32 -0.005, %v494_v48  ;;  %v605_v52 = vmul.f32 -0.005, %v492_v50 }
  0xf4   : > { %v1016_v51 = vpop.eup %1015  ;;  %1029 = vpow2.f32 %v679_v47 }
  0xf5   : > { %v1018_v53 = vpop.eup %1017  ;;  %791 = vst.msk [vmem:[%s1528_s22 + $0x38] sm:$0xff] %vm783_vm0, %v1016_v51  ;;  %v685_v54 = vmul.f32 1.442695, %v606_v49  ;;  %v683_v55 = vmul.f32 1.442695, %v605_v52 }
  0xf6   : > { %790 = vst.msk [vmem:[%s1528_s22 + $0x30] sm:$0xff] %vm783_vm0, %v1018_v53  ;;  %v498_v56 = vpop.xlane.xlu1 %497  ;;  %v496_v58 = vpop.xlane.xlu0 %495 }
  0xf7   : > { %1031 = vpow2.f32 %v685_v54  ;;  %v608_v57 = vmul.f32 -0.005, %v498_v56  ;;  %v607_v60 = vmul.f32 -0.005, %v496_v58 }
  0xf8   : > { %v1020_v59 = vpop.eup %1019  ;;  %1033 = vpow2.f32 %v683_v55 }
  0xf9   : > { %v1022_v61 = vpop.eup %1021  ;;  %793 = vst.msk [vmem:[%s1528_s22 + $0x48] sm:$0xff] %vm783_vm0, %v1020_v59  ;;  %v689_v62 = vmul.f32 1.442695, %v608_v57  ;;  %v687_v63 = vmul.f32 1.442695, %v607_v60 }
  0xfa   : > { %792 = vst.msk [vmem:[%s1528_s22 + $0x40] sm:$0xff] %vm783_vm0, %v1022_v61  ;;  %v502_v0 = vpop.xlane.xlu1 %501  ;;  %v500_v2 = vpop.xlane.xlu0 %499 }
  0xfb   : > { %1035 = vpow2.f32 %v689_v62  ;;  %v610_v1 = vmul.f32 -0.005, %v502_v0  ;;  %v609_v4 = vmul.f32 -0.005, %v500_v2 }
  0xfc   : > { %v1024_v3 = vpop.eup %1023  ;;  %1037 = vpow2.f32 %v687_v63 }
  0xfd   : > { %v1026_v5 = vpop.eup %1025  ;;  %795 = vst.msk [vmem:[%s1528_s22 + $0x58] sm:$0xff] %vm783_vm0, %v1024_v3  ;;  %v693_v6 = vmul.f32 1.442695, %v610_v1  ;;  %v691_v7 = vmul.f32 1.442695, %v609_v4 }
  0xfe   : > { %794 = vst.msk [vmem:[%s1528_s22 + $0x50] sm:$0xff] %vm783_vm0, %v1026_v5  ;;  %v506_v8 = vpop.xlane.xlu1 %505  ;;  %v504_v10 = vpop.xlane.xlu0 %503 }
  0xff   : > { %1039 = vpow2.f32 %v693_v6  ;;  %v612_v9 = vmul.f32 -0.005, %v506_v8  ;;  %v611_v12 = vmul.f32 -0.005, %v504_v10 }
 0x100   : > { %v1028_v11 = vpop.eup %1027  ;;  %1041 = vpow2.f32 %v691_v7 }
 0x101   : > { %v1030_v13 = vpop.eup %1029  ;;  %797 = vst.msk [vmem:[%s1528_s22 + $0x68] sm:$0xff] %vm783_vm0, %v1028_v11  ;;  %v697_v14 = vmul.f32 1.442695, %v612_v9  ;;  %v695_v15 = vmul.f32 1.442695, %v611_v12 }
 0x102   : > { %796 = vst.msk [vmem:[%s1528_s22 + $0x60] sm:$0xff] %vm783_vm0, %v1030_v13  ;;  %v510_v16 = vpop.xlane.xlu1 %509  ;;  %v508_v18 = vpop.xlane.xlu0 %507 }
 0x103   : > { %1043 = vpow2.f32 %v697_v14  ;;  %v614_v17 = vmul.f32 -0.005, %v510_v16  ;;  %v613_v20 = vmul.f32 -0.005, %v508_v18 }
 0x104   : > { %v1032_v19 = vpop.eup %1031  ;;  %1045 = vpow2.f32 %v695_v15 }
 0x105   : > { %v1034_v21 = vpop.eup %1033  ;;  %799 = vst.msk [vmem:[%s1528_s22 + $0x78] sm:$0xff] %vm783_vm0, %v1032_v19  ;;  %v701_v22 = vmul.f32 1.442695, %v614_v17  ;;  %v699_v23 = vmul.f32 1.442695, %v613_v20 }
 0x106   : > { %798 = vst.msk [vmem:[%s1528_s22 + $0x70] sm:$0xff] %vm783_vm0, %v1034_v21  ;;  %v514_v24 = vpop.xlane.xlu1 %513  ;;  %v512_v26 = vpop.xlane.xlu0 %511 }
 0x107   : > { %1047 = vpow2.f32 %v701_v22  ;;  %v616_v25 = vmul.f32 -0.005, %v514_v24  ;;  %v615_v28 = vmul.f32 -0.005, %v512_v26 }
 0x108   : > { %v1036_v27 = vpop.eup %1035  ;;  %1049 = vpow2.f32 %v699_v23 }
 0x109   : > { %v1038_v29 = vpop.eup %1037  ;;  %801 = vst.msk [vmem:[%s1528_s22 + $0x88] sm:$0xff] %vm783_vm0, %v1036_v27  ;;  %v705_v30 = vmul.f32 1.442695, %v616_v25  ;;  %v703_v31 = vmul.f32 1.442695, %v615_v28 }
 0x10a   : > { %800 = vst.msk [vmem:[%s1528_s22 + $0x80] sm:$0xff] %vm783_vm0, %v1038_v29  ;;  %v518_v32 = vpop.xlane.xlu1 %517  ;;  %v516_v34 = vpop.xlane.xlu0 %515 }
 0x10b   : > { %1051 = vpow2.f32 %v705_v30  ;;  %v618_v33 = vmul.f32 -0.005, %v518_v32  ;;  %v617_v36 = vmul.f32 -0.005, %v516_v34 }
 0x10c   : > { %v1040_v35 = vpop.eup %1039  ;;  %1053 = vpow2.f32 %v703_v31 }
 0x10d   : > { %v1042_v37 = vpop.eup %1041  ;;  %803 = vst.msk [vmem:[%s1528_s22 + $0x98] sm:$0xff] %vm783_vm0, %v1040_v35  ;;  %v709_v38 = vmul.f32 1.442695, %v618_v33  ;;  %v707_v39 = vmul.f32 1.442695, %v617_v36 }
 0x10e   : > { %802 = vst.msk [vmem:[%s1528_s22 + $0x90] sm:$0xff] %vm783_vm0, %v1042_v37  ;;  %v522_v40 = vpop.xlane.xlu1 %521  ;;  %v520_v42 = vpop.xlane.xlu0 %519 }
 0x10f   : > { %1055 = vpow2.f32 %v709_v38  ;;  %v620_v41 = vmul.f32 -0.005, %v522_v40  ;;  %v619_v44 = vmul.f32 -0.005, %v520_v42 }
 0x110   : > { %v1044_v43 = vpop.eup %1043  ;;  %1057 = vpow2.f32 %v707_v39 }
 0x111   : > { %v1046_v45 = vpop.eup %1045  ;;  %805 = vst.msk [vmem:[%s1528_s22 + $0xa8] sm:$0xff] %vm783_vm0, %v1044_v43  ;;  %v713_v46 = vmul.f32 1.442695, %v620_v41  ;;  %v711_v47 = vmul.f32 1.442695, %v619_v44 }
 0x112   : > { %804 = vst.msk [vmem:[%s1528_s22 + $0xa0] sm:$0xff] %vm783_vm0, %v1046_v45  ;;  %v526_v48 = vpop.xlane.xlu1 %525  ;;  %v524_v50 = vpop.xlane.xlu0 %523 }
 0x113   : > { %1059 = vpow2.f32 %v713_v46  ;;  %v622_v49 = vmul.f32 -0.005, %v526_v48  ;;  %v621_v52 = vmul.f32 -0.005, %v524_v50 }
 0x114   : > { %v1048_v51 = vpop.eup %1047  ;;  %1061 = vpow2.f32 %v711_v47 }
 0x115   : > { %v1050_v53 = vpop.eup %1049  ;;  %807 = vst.msk [vmem:[%s1528_s22 + $0xb8] sm:$0xff] %vm783_vm0, %v1048_v51  ;;  %v717_v54 = vmul.f32 1.442695, %v622_v49  ;;  %v715_v55 = vmul.f32 1.442695, %v621_v52 }
 0x116   : > { %806 = vst.msk [vmem:[%s1528_s22 + $0xb0] sm:$0xff] %vm783_vm0, %v1050_v53  ;;  %v530_v56 = vpop.xlane.xlu1 %529  ;;  %v528_v58 = vpop.xlane.xlu0 %527 }
 0x117   : > { %1063 = vpow2.f32 %v717_v54  ;;  %v624_v57 = vmul.f32 -0.005, %v530_v56  ;;  %v623_v60 = vmul.f32 -0.005, %v528_v58 }
 0x118   : > { %v1052_v59 = vpop.eup %1051  ;;  %1065 = vpow2.f32 %v715_v55 }
 0x119   : > { %v1054_v61 = vpop.eup %1053  ;;  %809 = vst.msk [vmem:[%s1528_s22 + $0xc8] sm:$0xff] %vm783_vm0, %v1052_v59  ;;  %v721_v62 = vmul.f32 1.442695, %v624_v57  ;;  %v719_v63 = vmul.f32 1.442695, %v623_v60 }
 0x11a   : > { %808 = vst.msk [vmem:[%s1528_s22 + $0xc0] sm:$0xff] %vm783_vm0, %v1054_v61  ;;  %v534_v0 = vpop.xlane.xlu1 %533  ;;  %v532_v2 = vpop.xlane.xlu0 %531 }
 0x11b   : > { %1067 = vpow2.f32 %v721_v62  ;;  %v626_v1 = vmul.f32 -0.005, %v534_v0  ;;  %v625_v4 = vmul.f32 -0.005, %v532_v2 }
 0x11c   : > { %v1056_v3 = vpop.eup %1055  ;;  %1069 = vpow2.f32 %v719_v63 }
 0x11d   : > { %v1058_v5 = vpop.eup %1057  ;;  %811 = vst.msk [vmem:[%s1528_s22 + $0xd8] sm:$0xff] %vm783_vm0, %v1056_v3  ;;  %v725_v6 = vmul.f32 1.442695, %v626_v1  ;;  %v723_v7 = vmul.f32 1.442695, %v625_v4 }
 0x11e   : > { %810 = vst.msk [vmem:[%s1528_s22 + $0xd0] sm:$0xff] %vm783_vm0, %v1058_v5  ;;  %v538_v8 = vpop.xlane.xlu1 %537  ;;  %v536_v10 = vpop.xlane.xlu0 %535 }
 0x11f   : > { %1071 = vpow2.f32 %v725_v6  ;;  %v628_v9 = vmul.f32 -0.005, %v538_v8  ;;  %v627_v12 = vmul.f32 -0.005, %v536_v10 }
 0x120   : > { %v1060_v11 = vpop.eup %1059  ;;  %1073 = vpow2.f32 %v723_v7 }
 0x121   : > { %v1062_v13 = vpop.eup %1061  ;;  %813 = vst.msk [vmem:[%s1528_s22 + $0xe8] sm:$0xff] %vm783_vm0, %v1060_v11  ;;  %v729_v14 = vmul.f32 1.442695, %v628_v9  ;;  %v727_v15 = vmul.f32 1.442695, %v627_v12 }
 0x122   : > { %812 = vst.msk [vmem:[%s1528_s22 + $0xe0] sm:$0xff] %vm783_vm0, %v1062_v13  ;;  %v542_v16 = vpop.xlane.xlu1 %541  ;;  %v540_v18 = vpop.xlane.xlu0 %539 }
 0x123   : > { %1075 = vpow2.f32 %v729_v14  ;;  %v630_v17 = vmul.f32 -0.005, %v542_v16  ;;  %v629_v20 = vmul.f32 -0.005, %v540_v18 }
 0x124   : > { %v1064_v19 = vpop.eup %1063  ;;  %1077 = vpow2.f32 %v727_v15 }
 0x125   : > { %v1066_v21 = vpop.eup %1065  ;;  %815 = vst.msk [vmem:[%s1528_s22 + $0xf8] sm:$0xff] %vm783_vm0, %v1064_v19  ;;  %v733_v22 = vmul.f32 1.442695, %v630_v17  ;;  %v731_v23 = vmul.f32 1.442695, %v629_v20 }
 0x126   : > { %814 = vst.msk [vmem:[%s1528_s22 + $0xf0] sm:$0xff] %vm783_vm0, %v1066_v21  ;;  %v546_v24 = vpop.xlane.xlu1 %545  ;;  %v544_v26 = vpop.xlane.xlu0 %543 }
 0x127   : > { %1079 = vpow2.f32 %v733_v22  ;;  %v632_v25 = vmul.f32 -0.005, %v546_v24  ;;  %v631_v28 = vmul.f32 -0.005, %v544_v26 }
 0x128   : > { %v1068_v27 = vpop.eup %1067  ;;  %1081 = vpow2.f32 %v731_v23 }
 0x129   : > { %v1070_v29 = vpop.eup %1069  ;;  %817 = vst.msk [vmem:[%s1528_s22 + $0x108] sm:$0xff] %vm783_vm0, %v1068_v27  ;;  %v737_v30 = vmul.f32 1.442695, %v632_v25  ;;  %v735_v31 = vmul.f32 1.442695, %v631_v28 }
 0x12a   : > { %816 = vst.msk [vmem:[%s1528_s22 + $0x100] sm:$0xff] %vm783_vm0, %v1070_v29  ;;  %v550_v32 = vpop.xlane.xlu1 %549  ;;  %v548_v34 = vpop.xlane.xlu0 %547 }
 0x12b   : > { %1083 = vpow2.f32 %v737_v30  ;;  %v634_v33 = vmul.f32 -0.005, %v550_v32  ;;  %v633_v36 = vmul.f32 -0.005, %v548_v34 }
 0x12c   : > { %v1072_v35 = vpop.eup %1071  ;;  %1085 = vpow2.f32 %v735_v31 }
 0x12d   : > { %v1074_v37 = vpop.eup %1073  ;;  %819 = vst.msk [vmem:[%s1528_s22 + $0x118] sm:$0xff] %vm783_vm0, %v1072_v35  ;;  %v741_v38 = vmul.f32 1.442695, %v634_v33  ;;  %v739_v39 = vmul.f32 1.442695, %v633_v36 }
 0x12e   : > { %818 = vst.msk [vmem:[%s1528_s22 + $0x110] sm:$0xff] %vm783_vm0, %v1074_v37  ;;  %v554_v40 = vpop.xlane.xlu1 %553  ;;  %v552_v42 = vpop.xlane.xlu0 %551 }
 0x12f   : > { %1087 = vpow2.f32 %v741_v38  ;;  %v636_v41 = vmul.f32 -0.005, %v554_v40  ;;  %v635_v44 = vmul.f32 -0.005, %v552_v42 }
 0x130   : > { %v1076_v43 = vpop.eup %1075  ;;  %1089 = vpow2.f32 %v739_v39 }
 0x131   : > { %v1078_v45 = vpop.eup %1077  ;;  %821 = vst.msk [vmem:[%s1528_s22 + $0x128] sm:$0xff] %vm783_vm0, %v1076_v43  ;;  %v745_v46 = vmul.f32 1.442695, %v636_v41  ;;  %v743_v47 = vmul.f32 1.442695, %v635_v44 }
 0x132   : > { %820 = vst.msk [vmem:[%s1528_s22 + $0x120] sm:$0xff] %vm783_vm0, %v1078_v45  ;;  %v558_v48 = vpop.xlane.xlu1 %557  ;;  %v556_v50 = vpop.xlane.xlu0 %555 }
 0x133   : > { %1091 = vpow2.f32 %v745_v46  ;;  %v638_v49 = vmul.f32 -0.005, %v558_v48  ;;  %v637_v52 = vmul.f32 -0.005, %v556_v50 }
 0x134   : > { %v1080_v51 = vpop.eup %1079  ;;  %1093 = vpow2.f32 %v743_v47 }
 0x135   : > { %v1082_v53 = vpop.eup %1081  ;;  %823 = vst.msk [vmem:[%s1528_s22 + $0x138] sm:$0xff] %vm783_vm0, %v1080_v51  ;;  %v749_v54 = vmul.f32 1.442695, %v638_v49  ;;  %v747_v55 = vmul.f32 1.442695, %v637_v52 }
 0x136   : > { %822 = vst.msk [vmem:[%s1528_s22 + $0x130] sm:$0xff] %vm783_vm0, %v1082_v53  ;;  %v562_v56 = vpop.xlane.xlu1 %561  ;;  %v560_v58 = vpop.xlane.xlu0 %559 }
 0x137   : > { %1095 = vpow2.f32 %v749_v54  ;;  %v640_v57 = vmul.f32 -0.005, %v562_v56  ;;  %v639_v60 = vmul.f32 -0.005, %v560_v58 }
 0x138   : > { %v1084_v59 = vpop.eup %1083  ;;  %1097 = vpow2.f32 %v747_v55 }
 0x139   : > { %v1086_v61 = vpop.eup %1085  ;;  %825 = vst.msk [vmem:[%s1528_s22 + $0x148] sm:$0xff] %vm783_vm0, %v1084_v59  ;;  %v753_v62 = vmul.f32 1.442695, %v640_v57  ;;  %v751_v63 = vmul.f32 1.442695, %v639_v60 }
 0x13a   : > { %824 = vst.msk [vmem:[%s1528_s22 + $0x140] sm:$0xff] %vm783_vm0, %v1086_v61  ;;  %v566_v0 = vpop.xlane.xlu1 %565  ;;  %v564_v2 = vpop.xlane.xlu0 %563 }
 0x13b   : > { %1099 = vpow2.f32 %v753_v62  ;;  %v642_v1 = vmul.f32 -0.005, %v566_v0  ;;  %v641_v4 = vmul.f32 -0.005, %v564_v2 }
 0x13c   : > { %v1088_v3 = vpop.eup %1087  ;;  %1101 = vpow2.f32 %v751_v63 }
 0x13d   : > { %v1090_v5 = vpop.eup %1089  ;;  %827 = vst.msk [vmem:[%s1528_s22 + $0x158] sm:$0xff] %vm783_vm0, %v1088_v3  ;;  %v757_v6 = vmul.f32 1.442695, %v642_v1  ;;  %v755_v7 = vmul.f32 1.442695, %v641_v4 }
 0x13e   : > { %826 = vst.msk [vmem:[%s1528_s22 + $0x150] sm:$0xff] %vm783_vm0, %v1090_v5  ;;  %v570_v8 = vpop.xlane.xlu1 %569  ;;  %v568_v10 = vpop.xlane.xlu0 %567 }
 0x13f   : > { %1103 = vpow2.f32 %v757_v6  ;;  %v644_v9 = vmul.f32 -0.005, %v570_v8  ;;  %v643_v12 = vmul.f32 -0.005, %v568_v10 }
 0x140   : > { %v1092_v11 = vpop.eup %1091  ;;  %1105 = vpow2.f32 %v755_v7 }
 0x141   : > { %v1094_v13 = vpop.eup %1093  ;;  %829 = vst.msk [vmem:[%s1528_s22 + $0x168] sm:$0xff] %vm783_vm0, %v1092_v11  ;;  %v761_v14 = vmul.f32 1.442695, %v644_v9  ;;  %v759_v15 = vmul.f32 1.442695, %v643_v12 }
 0x142   : > { %828 = vst.msk [vmem:[%s1528_s22 + $0x160] sm:$0xff] %vm783_vm0, %v1094_v13  ;;  %v574_v16 = vpop.xlane.xlu1 %573  ;;  %v572_v18 = vpop.xlane.xlu0 %571 }
 0x143   : > { %1107 = vpow2.f32 %v761_v14  ;;  %v646_v17 = vmul.f32 -0.005, %v574_v16  ;;  %v645_v20 = vmul.f32 -0.005, %v572_v18 }
 0x144   : > { %v1096_v19 = vpop.eup %1095  ;;  %1109 = vpow2.f32 %v759_v15 }
 0x145   : > { %v1098_v21 = vpop.eup %1097  ;;  %831 = vst.msk [vmem:[%s1528_s22 + $0x178] sm:$0xff] %vm783_vm0, %v1096_v19  ;;  %v765_v22 = vmul.f32 1.442695, %v646_v17  ;;  %v763_v23 = vmul.f32 1.442695, %v645_v20 }
 0x146   : > { %830 = vst.msk [vmem:[%s1528_s22 + $0x170] sm:$0xff] %vm783_vm0, %v1098_v21  ;;  %v578_v24 = vpop.xlane.xlu1 %577  ;;  %v576_v26 = vpop.xlane.xlu0 %575 }
 0x147   : > { %1111 = vpow2.f32 %v765_v22  ;;  %v648_v25 = vmul.f32 -0.005, %v578_v24  ;;  %v647_v28 = vmul.f32 -0.005, %v576_v26 }
 0x148   : > { %v1100_v27 = vpop.eup %1099  ;;  %1113 = vpow2.f32 %v763_v23 }
 0x149   : > { %v1102_v29 = vpop.eup %1101  ;;  %833 = vst.msk [vmem:[%s1528_s22 + $0x188] sm:$0xff] %vm783_vm0, %v1100_v27  ;;  %v769_v30 = vmul.f32 1.442695, %v648_v25  ;;  %v767_v31 = vmul.f32 1.442695, %v647_v28 }
 0x14a   : > { %832 = vst.msk [vmem:[%s1528_s22 + $0x180] sm:$0xff] %vm783_vm0, %v1102_v29  ;;  %v582_v32 = vpop.xlane.xlu1 %581  ;;  %v580_v34 = vpop.xlane.xlu0 %579 }
 0x14b   : > { %1115 = vpow2.f32 %v769_v30  ;;  %v650_v33 = vmul.f32 -0.005, %v582_v32  ;;  %v649_v36 = vmul.f32 -0.005, %v580_v34 }
 0x14c   : > { %v1104_v35 = vpop.eup %1103  ;;  %1117 = vpow2.f32 %v767_v31 }
 0x14d   : > { %v1106_v37 = vpop.eup %1105  ;;  %835 = vst.msk [vmem:[%s1528_s22 + $0x198] sm:$0xff] %vm783_vm0, %v1104_v35  ;;  %v773_v38 = vmul.f32 1.442695, %v650_v33  ;;  %v771_v39 = vmul.f32 1.442695, %v649_v36 }
 0x14e   : > { %834 = vst.msk [vmem:[%s1528_s22 + $0x190] sm:$0xff] %vm783_vm0, %v1106_v37  ;;  %v586_v40 = vpop.xlane.xlu1 %585  ;;  %v584_v42 = vpop.xlane.xlu0 %583 }
 0x14f   : > { %1119 = vpow2.f32 %v773_v38  ;;  %v652_v41 = vmul.f32 -0.005, %v586_v40  ;;  %v651_v44 = vmul.f32 -0.005, %v584_v42 }
 0x150   : > { %v1108_v43 = vpop.eup %1107  ;;  %1121 = vpow2.f32 %v771_v39 }
 0x151   : > { %v1110_v45 = vpop.eup %1109  ;;  %837 = vst.msk [vmem:[%s1528_s22 + $0x1a8] sm:$0xff] %vm783_vm0, %v1108_v43  ;;  %v777_v46 = vmul.f32 1.442695, %v652_v41  ;;  %v775_v47 = vmul.f32 1.442695, %v651_v44 }
 0x152   : > { %836 = vst.msk [vmem:[%s1528_s22 + $0x1a0] sm:$0xff] %vm783_vm0, %v1110_v45  ;;  %v590_v48 = vpop.xlane.xlu1 %589  ;;  %v588_v50 = vpop.xlane.xlu0 %587 }
 0x153   : > { %1123 = vpow2.f32 %v777_v46  ;;  %v654_v49 = vmul.f32 -0.005, %v590_v48  ;;  %v653_v52 = vmul.f32 -0.005, %v588_v50 }
 0x154   : > { %v1112_v51 = vpop.eup %1111  ;;  %1125 = vpow2.f32 %v775_v47 }
 0x155   : > { %v1114_v53 = vpop.eup %1113  ;;  %839 = vst.msk [vmem:[%s1528_s22 + $0x1b8] sm:$0xff] %vm783_vm0, %v1112_v51  ;;  %v781_v54 = vmul.f32 1.442695, %v654_v49  ;;  %v779_v55 = vmul.f32 1.442695, %v653_v52 }
 0x156   : > { %838 = vst.msk [vmem:[%s1528_s22 + $0x1b0] sm:$0xff] %vm783_vm0, %v1114_v53 }
 0x157   : > { %1127 = vpow2.f32 %v781_v54 }
 0x158   : > { %v1116_v56 = vpop.eup %1115  ;;  %1129 = vpow2.f32 %v779_v55 }
 0x159   : > { %v1118_v57 = vpop.eup %1117  ;;  %841 = vst.msk [vmem:[%s1528_s22 + $0x1c8] sm:$0xff] %vm783_vm0, %v1116_v56 }
 0x15a   : > { %840 = vst.msk [vmem:[%s1528_s22 + $0x1c0] sm:$0xff] %vm783_vm0, %v1118_v57 }
 0x15c   : > { %v1120_v58 = vpop.eup %1119 }
 0x15d   : > { %v1122_v59 = vpop.eup %1121  ;;  %843 = vst.msk [vmem:[%s1528_s22 + $0x1d8] sm:$0xff] %vm783_vm0, %v1120_v58 }
 0x15e   : > { %842 = vst.msk [vmem:[%s1528_s22 + $0x1d0] sm:$0xff] %vm783_vm0, %v1122_v59 }
 0x160   : > { %v1124_v60 = vpop.eup %1123 }
 0x161   : > { %v1126_v61 = vpop.eup %1125  ;;  %845 = vst.msk [vmem:[%s1528_s22 + $0x1e8] sm:$0xff] %vm783_vm0, %v1124_v60 }
 0x162   : > { %844 = vst.msk [vmem:[%s1528_s22 + $0x1e0] sm:$0xff] %vm783_vm0, %v1126_v61 }
 0x164   : > { %v1128_v62 = vpop.eup %1127 }
 0x165   : > { %v1130_v63 = vpop.eup %1129  ;;  %847 = vst.msk [vmem:[%s1528_s22 + $0x1f8] sm:$0xff] %vm783_vm0, %v1128_v62 }
 0x166   : > { %846 = vst.msk [vmem:[%s1528_s22 + $0x1f0] sm:$0xff] %vm783_vm0, %v1130_v63 }
 0x167 PF: > { %p15_p11 = scmp.ge.s32.totalorder %s1266_s14, 6   ;;  %s1680_s9 = smov %s1217_s10 }
 0x168   : > { %s1681_s10 = smov %s1221_s11  ;;  %s1682_s11 = smov %s1276_s17 }
 0x169   : > { %s1683_s12 = smov %s1266_s14  ;;  %17 = sbr.rel (!%p15_p11) target bundleno = 5 (0x5), region = 81 }
 0x16e   :  { %870 = vsyncpa [#allocation3], 1 }
 0x16f   :  { %872 = vsyncpa [#allocation3 + $0x1], 1 }
 0x170   :  { %873 = vsyncpa [#allocation5], 1 }
 0x171   :  { %875 = vsyncpa [#allocation5 + $0x1], 1 }

</bundles_post_ra>
